<compile_context>
chip_gen: v7x
topology: tpu7x:2x2x1
jax: 0.10.0
libtpu: 0.0.40
codegen_flags: <defaults>
</compile_context>

<pallas_src>
import jax
import jax.numpy as jnp
from jax.experimental import pallas as pl
from jax.experimental.pallas import tpu as pltpu


def _tcm_kernel(mem_ref, feat_ref, w_in_ref, b_in_ref, w_agg_ref, b_out_ref, out_ref):
    # mem_ref   : (1, hist_len, H, W*C)        history frames, (w, c) flattened on lanes
    # feat_ref  : (1, H, W*C)                  current frame
    # w_in_ref  : (W*C, W*Cmid)     bf16       block-diagonal 1x1-conv weight
    # b_in_ref  : (1, W*Cmid)       f32        conv_in bias tiled over w
    # w_agg_ref : (3*T*W*Cmid, W*C) bf16       banded conv_agg weight + last-frame copy
    # b_out_ref : (1, W*C)          f32        b_agg on agg lanes, 0 on copy lanes
    # out_ref   : (1, H, W*C)                  concat([conv_agg(hist), conv_in(feat)], ch)
    _, hist_len, H, WC = mem_ref.shape
    T = hist_len + 1
    WCmid = w_in_ref.shape[1]

    # ---- conv_in (1x1 conv) on all T frames: one lane-dense matmul (K=W*C, N=W*Cmid) ----
    x = jnp.concatenate(
        [mem_ref[0].reshape(hist_len * H, WC), feat_ref[0]], axis=0)      # (T*H, W*C)
    f = jnp.dot(x.astype(jnp.bfloat16), w_in_ref[...],
                preferred_element_type=jnp.float32) + b_in_ref[...]       # (T*H, W*Cmid) f32
    f = f.astype(jnp.bfloat16).reshape(T, H, WCmid)

    # ---- zero-pad H by 1 row (conv3d padding=(0,1,1)); W padding is folded into w_agg ----
    zrow = jnp.zeros((T, 1, WCmid), jnp.bfloat16)
    fpad = jnp.concatenate([zrow, f, zrow], axis=1)                       # (T, H+2, W*Cmid)

    # ---- im2col over (t, kh) -> ONE matmul produces the full lane-dense output block ----
    cols = [fpad[t, kh:kh + H, :] for t in range(T) for kh in range(3)]
    a = jnp.concatenate(cols, axis=-1)                                    # (H, 3*T*W*Cmid)
    out = jnp.dot(a, w_agg_ref[...],
                  preferred_element_type=jnp.float32) + b_out_ref[...]    # (H, W*C) f32
    out_ref[0] = out.astype(out_ref.dtype)                                # single aligned store


def _build_fused_weights(w_in, b_in, w_agg, b_agg, W, C, T):
    """Rearrange PyTorch weights into the two lane-dense matmul operands (wrapper side)."""
    Cmid = C // 2
    f32 = jnp.float32
    eye_w = jnp.eye(W, dtype=f32)

    # 1x1 conv as a block-diagonal matrix acting on the flattened (w, c) lane axis.
    #   w_in_blk[v*C + c, w*Cmid + o] = w_in[o, c] * [v == w]
    w_in_blk = jnp.einsum('vw,oc->vcwo', eye_w, w_in.astype(f32)).reshape(W * C, W * Cmid)
    b_in_t = jnp.tile(b_in.astype(f32), W).reshape(1, W * Cmid)

    # conv_agg as a banded block matrix over the flattened (w, cmid) lane axis.
    #   row r = ((t*3 + kh)*W + v)*Cmid + i multiplies feat_in[t, h+kh-1, v, i]
    #   col q = w*C + o (o <  Cmid): agg output, kw = v - w + 1 (|v-w|<=1, else 0 = W pad)
    #   col q = w*C + o (o >= Cmid): identity copy of frame T-1 (feat_in of current frame)
    bands = jnp.stack([jnp.eye(W, k=1, dtype=f32),      # kw=0 : v = w-1
                       jnp.eye(W, k=0, dtype=f32),      # kw=1 : v = w
                       jnp.eye(W, k=-1, dtype=f32)],    # kw=2 : v = w+1
                      axis=0)                                              # (3, v, w)
    # w_agg is (O, I, T, kH, kW)  ->  g[t, kh, v, i, w, o]
    g = jnp.einsum('kvw,oithk->thviwo', bands, w_agg.astype(f32))
    w_full = jnp.zeros((T * 3, W, Cmid, W, C), f32)
    w_full = w_full.at[:, :, :, :, :Cmid].set(g.reshape(T * 3, W, Cmid, W, Cmid))
    copy_blk = jnp.einsum('vw,ij->viwj', eye_w, jnp.eye(Cmid, dtype=f32))  # (W,Cmid,W,Cmid)
    w_full = w_full.at[(T - 1) * 3 + 1, :, :, :, Cmid:].set(copy_blk)
    w_agg_2d = w_full.reshape(T * 3 * W * Cmid, W * C)
    b_out = jnp.tile(jnp.concatenate([b_agg.astype(f32), jnp.zeros((Cmid,), f32)]), W)
    return (w_in_blk.astype(jnp.bfloat16), b_in_t,
            w_agg_2d.astype(jnp.bfloat16), b_out.reshape(1, W * C))


def temporal_context_module(feat, feat_mem, w_in, b_in, w_agg, b_agg):
    """Unrolled forward.

    feat:     (B, H, W, C)            channels-last
    feat_mem: (B, hist_len, H, W, C)  channels-last
    w_in:     (Cmid, C)               PyTorch Conv2d 1x1 weight (out, in)
    b_in:     (Cmid,)
    w_agg:    (Cmid, Cmid, T, 3, 3)   PyTorch Conv3d weight (out, in, D, kH, kW)
    b_agg:    (Cmid,)
    returns:  (B, H, W, C)
    """
    B, H, W, C = feat.shape
    hist_len = feat_mem.shape[1]
    T = hist_len + 1
    assert C % 2 == 0, "in_features must be even"
    Cmid = C // 2

    w_in_blk, b_in_t, w_agg_2d, b_out = _build_fused_weights(w_in, b_in, w_agg, b_agg, W, C, T)

    # Free HBM reshapes: flatten (W, C) onto the lane axis (W*C = 128 for the test shape).
    feat2 = feat.reshape(B, H, W * C)
    mem2 = feat_mem.reshape(B, hist_len, H, W * C)

    out = pl.pallas_call(
        _tcm_kernel,
        out_shape=jax.ShapeDtypeStruct((B, H, W * C), feat.dtype),
        grid_spec=pltpu.PrefetchScalarGridSpec(
            num_scalar_prefetch=0,
            grid=(B,),
            in_specs=[
                pl.BlockSpec((1, hist_len, H, W * C), lambda b: (b, 0, 0, 0)),
                pl.BlockSpec((1, H, W * C), lambda b: (b, 0, 0)),
                pl.BlockSpec((W * C, W * Cmid), lambda b: (0, 0)),
                pl.BlockSpec((1, W * Cmid), lambda b: (0, 0)),
                pl.BlockSpec((3 * T * W * Cmid, W * C), lambda b: (0, 0)),
                pl.BlockSpec((1, W * C), lambda b: (0, 0)),
            ],
            out_specs=pl.BlockSpec((1, H, W * C), lambda b: (b, 0, 0)),
        ),
        compiler_params=pltpu.CompilerParams(
            dimension_semantics=("parallel",),
            vmem_limit_bytes=32 * 1024 * 1024,
        ),
    )(mem2, feat2, w_in_blk, b_in_t, w_agg_2d, b_out)
    return out.reshape(B, H, W, C)


def reference_nchw(feat, feat_mem, w_in, b_in, w_agg, b_agg):
    """Pure-JAX reference mirroring the PyTorch module (NCHW / NCDHW), f32 HIGHEST."""
    hist = jnp.concatenate([feat_mem, feat[:, None]], axis=1)            # (B, T, C, H, W)
    B, T, C, H, W = hist.shape
    Cmid = C // 2
    x = hist.reshape(B * T, C, H, W)
    y = jax.lax.conv_general_dilated(
        x, w_in.reshape(Cmid, C, 1, 1), (1, 1), 'VALID',
        dimension_numbers=('NCHW', 'OIHW', 'NCHW'),
        precision=jax.lax.Precision.HIGHEST,
    ) + b_in[None, :, None, None]
    y = y.reshape(B, T, Cmid, H, W)
    vol = jnp.transpose(y, (0, 2, 1, 3, 4))                              # (B, Cmid, T, H, W)
    agg = jax.lax.conv_general_dilated(
        vol, w_agg, (1, 1, 1), [(0, 0), (1, 1), (1, 1)],
        dimension_numbers=('NCDHW', 'OIDHW', 'NCDHW'),
        precision=jax.lax.Precision.HIGHEST,
    ) + b_agg[None, :, None, None, None]
    agg = agg[:, :, 0]                                                   # (B, Cmid, H, W)
    return jnp.concatenate([agg, y[:, -1]], axis=1)                      # (B, C, H, W)


if __name__ == "__main__":
    B, C, H, W = 2, 8, 16, 16
    hist_len = 5
    T = hist_len + 1
    Cmid = C // 2

    key = jax.random.PRNGKey(0)
    k = jax.random.split(key, 6)
    feat_nchw = jax.random.normal(k[0], (B, C, H, W), jnp.float32)
    mem_nchw = jax.random.normal(k[1], (B, hist_len, C, H, W), jnp.float32)
    w_in = 0.1 * jax.random.normal(k[2], (Cmid, C), jnp.float32)               # Conv2d 1x1 (O, I)
    b_in = 0.1 * jax.random.normal(k[3], (Cmid,), jnp.float32)
    w_agg = 0.1 * jax.random.normal(k[4], (Cmid, Cmid, T, 3, 3), jnp.float32)  # Conv3d (O,I,D,kH,kW)
    b_agg = 0.1 * jax.random.normal(k[5], (Cmid,), jnp.float32)

    # channels-last views for the Pallas kernel
    feat = jnp.transpose(feat_nchw, (0, 2, 3, 1))                        # (B, H, W, C)
    feat_mem = jnp.transpose(mem_nchw, (0, 1, 3, 4, 2))                  # (B, hist_len, H, W, C)

    out = jax.jit(temporal_context_module)(feat, feat_mem, w_in, b_in, w_agg, b_agg)
    out = jax.block_until_ready(out)

    ref = reference_nchw(feat_nchw, mem_nchw, w_in, b_in, w_agg, b_agg)
    ref = jnp.transpose(ref, (0, 2, 3, 1))                               # -> (B, H, W, C)

    assert out.shape == (B, H, W, C), out.shape
    max_err = float(jnp.max(jnp.abs(out - ref)))
    # Tolerance loosened vs. the Precision.HIGHEST version: matmuls now run with bf16
    # operands (f32 accumulation), per the performance review.
    assert jnp.allclose(out, ref, atol=5e-2, rtol=5e-2), f"max abs err {max_err}"
    print("KERNEL_OK")
</pallas_src>

<mosaic_0001>
module attributes {stable_mosaic.version = 11 : i64} {
  func.func @_tcm_kernel(%arg0: i32, %arg1: memref<1x5x16x128xf32, #tpu.memory_space<vmem>>, %arg2: memref<1x16x128xf32, #tpu.memory_space<vmem>>, %arg3: memref<128x64xbf16, #tpu.memory_space<vmem>>, %arg4: memref<1x64xf32, #tpu.memory_space<vmem>>, %arg5: memref<1152x128xbf16, #tpu.memory_space<vmem>>, %arg6: memref<1x128xf32, #tpu.memory_space<vmem>>, %arg7: memref<1x16x128xf32, #tpu.memory_space<vmem>>) attributes {dimension_semantics = [#tpu.dimension_semantics<parallel>], iteration_bounds = array<i64: 2>, scalar_prefetch = 0 : i64, scratch_operands = 0 : i64, tpu.core_type = #tpu.core_type<tc>, window_params = [{transform_indices = @transform_0, window_bounds = array<i64: 1, 5, 16, 128>}, {transform_indices = @transform_1, window_bounds = array<i64: 1, 16, 128>}, {pipeline_mode = #tpu.pipeline_mode<synchronous>, transform_indices = @transform_2, window_bounds = array<i64: 128, 64>}, {pipeline_mode = #tpu.pipeline_mode<synchronous>, transform_indices = @transform_3, window_bounds = array<i64: 1, 64>}, {pipeline_mode = #tpu.pipeline_mode<synchronous>, transform_indices = @transform_4, window_bounds = array<i64: 1152, 128>}, {pipeline_mode = #tpu.pipeline_mode<synchronous>, transform_indices = @transform_5, window_bounds = array<i64: 1, 128>}, {transform_indices = @transform_6, window_bounds = array<i64: 1, 16, 128>}]} {
    %c0 = arith.constant 0 : index
    %c0_0 = arith.constant 0 : index
    %c0_1 = arith.constant 0 : index
    %c0_2 = arith.constant 0 : index
    %0 = vector.load %arg1[%c0, %c0_0, %c0_1, %c0_2] : memref<1x5x16x128xf32, #tpu.memory_space<vmem>>, vector<1x5x16x128xf32>
    %1 = vector.shape_cast %0 : vector<1x5x16x128xf32> to vector<5x16x128xf32>
    %2 = vector.shape_cast %1 : vector<5x16x128xf32> to vector<80x128xf32>
    %c0_3 = arith.constant 0 : index
    %c0_4 = arith.constant 0 : index
    %c0_5 = arith.constant 0 : index
    %3 = vector.load %arg2[%c0_3, %c0_4, %c0_5] : memref<1x16x128xf32, #tpu.memory_space<vmem>>, vector<1x16x128xf32>
    %4 = vector.shape_cast %3 : vector<1x16x128xf32> to vector<16x128xf32>
    %5 = tpu.concatenate %2, %4 in 0 : vector<80x128xf32>, vector<16x128xf32> -> vector<96x128xf32>
    %6 = arith.truncf %5 : vector<96x128xf32> to vector<96x128xbf16>
    %c0_6 = arith.constant 0 : index
    %c0_7 = arith.constant 0 : index
    %7 = vector.load %arg3[%c0_6, %c0_7] : memref<128x64xbf16, #tpu.memory_space<vmem>>, vector<128x64xbf16>
    %cst = arith.constant dense<0.000000e+00> : vector<96x64xf32>
    %8 = tpu.matmul %6, %7, %cst {dimension_numbers = #tpu.dot_dimension_numbers<[1], [0], [0], [1], [0, 0, 1, 1], [], []>} : vector<96x128xbf16>, vector<128x64xbf16>, vector<96x64xf32> -> vector<96x64xf32>
    %c0_8 = arith.constant 0 : index
    %c0_9 = arith.constant 0 : index
    %9 = vector.load %arg4[%c0_8, %c0_9] : memref<1x64xf32, #tpu.memory_space<vmem>>, vector<1x64xf32>
    %10 = vector.broadcast %9 : vector<1x64xf32> to vector<96x64xf32>
    %11 = arith.addf %8, %10 : vector<96x64xf32>
    %12 = arith.truncf %11 : vector<96x64xf32> to vector<96x64xbf16>
    %13 = vector.shape_cast %12 : vector<96x64xbf16> to vector<6x16x64xbf16>
    %cst_10 = arith.constant 0.000000e+00 : bf16
    %14 = vector.broadcast %cst_10 : bf16 to vector<6x1x64xbf16>
    %15 = tpu.concatenate %14, %13, %14 in 1 : vector<6x1x64xbf16>, vector<6x16x64xbf16>, vector<6x1x64xbf16> -> vector<6x18x64xbf16>
    %16 = vector.extract_strided_slice %15 {offsets = [0, 0, 0], sizes = [1, 16, 64], strides = [1, 1, 1]} : vector<6x18x64xbf16> to vector<1x16x64xbf16>
    %17 = vector.shape_cast %16 : vector<1x16x64xbf16> to vector<16x64xbf16>
    %18 = vector.extract_strided_slice %15 {offsets = [0, 1, 0], sizes = [1, 16, 64], strides = [1, 1, 1]} : vector<6x18x64xbf16> to vector<1x16x64xbf16>
    %19 = vector.shape_cast %18 : vector<1x16x64xbf16> to vector<16x64xbf16>
    %20 = vector.extract_strided_slice %15 {offsets = [0, 2, 0], sizes = [1, 16, 64], strides = [1, 1, 1]} : vector<6x18x64xbf16> to vector<1x16x64xbf16>
    %21 = vector.shape_cast %20 : vector<1x16x64xbf16> to vector<16x64xbf16>
    %22 = vector.extract_strided_slice %15 {offsets = [1, 0, 0], sizes = [1, 16, 64], strides = [1, 1, 1]} : vector<6x18x64xbf16> to vector<1x16x64xbf16>
    %23 = vector.shape_cast %22 : vector<1x16x64xbf16> to vector<16x64xbf16>
    %24 = vector.extract_strided_slice %15 {offsets = [1, 1, 0], sizes = [1, 16, 64], strides = [1, 1, 1]} : vector<6x18x64xbf16> to vector<1x16x64xbf16>
    %25 = vector.shape_cast %24 : vector<1x16x64xbf16> to vector<16x64xbf16>
    %26 = vector.extract_strided_slice %15 {offsets = [1, 2, 0], sizes = [1, 16, 64], strides = [1, 1, 1]} : vector<6x18x64xbf16> to vector<1x16x64xbf16>
    %27 = vector.shape_cast %26 : vector<1x16x64xbf16> to vector<16x64xbf16>
    %28 = vector.extract_strided_slice %15 {offsets = [2, 0, 0], sizes = [1, 16, 64], strides = [1, 1, 1]} : vector<6x18x64xbf16> to vector<1x16x64xbf16>
    %29 = vector.shape_cast %28 : vector<1x16x64xbf16> to vector<16x64xbf16>
    %30 = vector.extract_strided_slice %15 {offsets = [2, 1, 0], sizes = [1, 16, 64], strides = [1, 1, 1]} : vector<6x18x64xbf16> to vector<1x16x64xbf16>
    %31 = vector.shape_cast %30 : vector<1x16x64xbf16> to vector<16x64xbf16>
    %32 = vector.extract_strided_slice %15 {offsets = [2, 2, 0], sizes = [1, 16, 64], strides = [1, 1, 1]} : vector<6x18x64xbf16> to vector<1x16x64xbf16>
    %33 = vector.shape_cast %32 : vector<1x16x64xbf16> to vector<16x64xbf16>
    %34 = vector.extract_strided_slice %15 {offsets = [3, 0, 0], sizes = [1, 16, 64], strides = [1, 1, 1]} : vector<6x18x64xbf16> to vector<1x16x64xbf16>
    %35 = vector.shape_cast %34 : vector<1x16x64xbf16> to vector<16x64xbf16>
    %36 = vector.extract_strided_slice %15 {offsets = [3, 1, 0], sizes = [1, 16, 64], strides = [1, 1, 1]} : vector<6x18x64xbf16> to vector<1x16x64xbf16>
    %37 = vector.shape_cast %36 : vector<1x16x64xbf16> to vector<16x64xbf16>
    %38 = vector.extract_strided_slice %15 {offsets = [3, 2, 0], sizes = [1, 16, 64], strides = [1, 1, 1]} : vector<6x18x64xbf16> to vector<1x16x64xbf16>
    %39 = vector.shape_cast %38 : vector<1x16x64xbf16> to vector<16x64xbf16>
    %40 = vector.extract_strided_slice %15 {offsets = [4, 0, 0], sizes = [1, 16, 64], strides = [1, 1, 1]} : vector<6x18x64xbf16> to vector<1x16x64xbf16>
    %41 = vector.shape_cast %40 : vector<1x16x64xbf16> to vector<16x64xbf16>
    %42 = vector.extract_strided_slice %15 {offsets = [4, 1, 0], sizes = [1, 16, 64], strides = [1, 1, 1]} : vector<6x18x64xbf16> to vector<1x16x64xbf16>
    %43 = vector.shape_cast %42 : vector<1x16x64xbf16> to vector<16x64xbf16>
    %44 = vector.extract_strided_slice %15 {offsets = [4, 2, 0], sizes = [1, 16, 64], strides = [1, 1, 1]} : vector<6x18x64xbf16> to vector<1x16x64xbf16>
    %45 = vector.shape_cast %44 : vector<1x16x64xbf16> to vector<16x64xbf16>
    %46 = vector.extract_strided_slice %15 {offsets = [5, 0, 0], sizes = [1, 16, 64], strides = [1, 1, 1]} : vector<6x18x64xbf16> to vector<1x16x64xbf16>
    %47 = vector.shape_cast %46 : vector<1x16x64xbf16> to vector<16x64xbf16>
    %48 = vector.extract_strided_slice %15 {offsets = [5, 1, 0], sizes = [1, 16, 64], strides = [1, 1, 1]} : vector<6x18x64xbf16> to vector<1x16x64xbf16>
    %49 = vector.shape_cast %48 : vector<1x16x64xbf16> to vector<16x64xbf16>
    %50 = vector.extract_strided_slice %15 {offsets = [5, 2, 0], sizes = [1, 16, 64], strides = [1, 1, 1]} : vector<6x18x64xbf16> to vector<1x16x64xbf16>
    %51 = vector.shape_cast %50 : vector<1x16x64xbf16> to vector<16x64xbf16>
    %52 = tpu.concatenate %17, %19, %21, %23, %25, %27, %29, %31, %33, %35, %37, %39, %41, %43, %45, %47 in 1 : vector<16x64xbf16>, vector<16x64xbf16>, vector<16x64xbf16>, vector<16x64xbf16>, vector<16x64xbf16>, vector<16x64xbf16>, vector<16x64xbf16>, vector<16x64xbf16>, vector<16x64xbf16>, vector<16x64xbf16>, vector<16x64xbf16>, vector<16x64xbf16>, vector<16x64xbf16>, vector<16x64xbf16>, vector<16x64xbf16>, vector<16x64xbf16> -> vector<16x1024xbf16>
    %53 = tpu.concatenate %49, %51 in 1 : vector<16x64xbf16>, vector<16x64xbf16> -> vector<16x128xbf16>
    %54 = tpu.concatenate %52, %53 in 1 : vector<16x1024xbf16>, vector<16x128xbf16> -> vector<16x1152xbf16>
    %c0_11 = arith.constant 0 : index
    %c0_12 = arith.constant 0 : index
    %55 = vector.load %arg5[%c0_11, %c0_12] : memref<1152x128xbf16, #tpu.memory_space<vmem>>, vector<1152x128xbf16>
    %cst_13 = arith.constant dense<0.000000e+00> : vector<16x128xf32>
    %56 = tpu.matmul %54, %55, %cst_13 {dimension_numbers = #tpu.dot_dimension_numbers<[1], [0], [0], [1], [0, 0, 1, 1], [], []>} : vector<16x1152xbf16>, vector<1152x128xbf16>, vector<16x128xf32> -> vector<16x128xf32>
    %c0_14 = arith.constant 0 : index
    %c0_15 = arith.constant 0 : index
    %57 = vector.load %arg6[%c0_14, %c0_15] : memref<1x128xf32, #tpu.memory_space<vmem>>, vector<1x128xf32>
    %58 = vector.broadcast %57 : vector<1x128xf32> to vector<16x128xf32>
    %59 = arith.addf %56, %58 : vector<16x128xf32>
    %c0_16 = arith.constant 0 : index
    %c0_17 = arith.constant 0 : index
    %c0_18 = arith.constant 0 : index
    %60 = vector.load %arg7[%c0_16, %c0_17, %c0_18] : memref<1x16x128xf32, #tpu.memory_space<vmem>>, vector<1x16x128xf32>
    %61 = vector.shape_cast %60 : vector<1x16x128xf32> to vector<16x128xf32>
    %62 = vector.shape_cast %59 : vector<16x128xf32> to vector<1x16x128xf32>
    tpu.vector_store %arg7[%c0_16, %c0_17, %c0_18], %62 {strides = array<i32>} : memref<1x16x128xf32, #tpu.memory_space<vmem>>, vector<1x16x128xf32>,
    return
  }
  func.func @transform_0(%arg0: i32) -> (i32, i32, i32, i32) {
    %c0_i32 = arith.constant 0 : i32
    %c0_i32_0 = arith.constant 0 : i32
    %c0_i32_1 = arith.constant 0 : i32
    %c0_i32_2 = arith.constant 0 : i32
    return %arg0, %c0_i32, %c0_i32_0, %c0_i32_1 : i32, i32, i32, i32
  }
  func.func @transform_1(%arg0: i32) -> (i32, i32, i32) {
    %c0_i32 = arith.constant 0 : i32
    %c0_i32_0 = arith.constant 0 : i32
    %c0_i32_1 = arith.constant 0 : i32
    return %arg0, %c0_i32, %c0_i32_0 : i32, i32, i32
  }
  func.func @transform_2(%arg0: i32) -> (i32, i32) {
    %c0_i32 = arith.constant 0 : i32
    %c0_i32_0 = arith.constant 0 : i32
    %c0_i32_1 = arith.constant 0 : i32
    return %c0_i32, %c0_i32_0 : i32, i32
  }
  func.func @transform_3(%arg0: i32) -> (i32, i32) {
    %c0_i32 = arith.constant 0 : i32
    %c0_i32_0 = arith.constant 0 : i32
    %c0_i32_1 = arith.constant 0 : i32
    return %c0_i32, %c0_i32_0 : i32, i32
  }
  func.func @transform_4(%arg0: i32) -> (i32, i32) {
    %c0_i32 = arith.constant 0 : i32
    %c0_i32_0 = arith.constant 0 : i32
    %c0_i32_1 = arith.constant 0 : i32
    return %c0_i32, %c0_i32_0 : i32, i32
  }
  func.func @transform_5(%arg0: i32) -> (i32, i32) {
    %c0_i32 = arith.constant 0 : i32
    %c0_i32_0 = arith.constant 0 : i32
    %c0_i32_1 = arith.constant 0 : i32
    return %c0_i32, %c0_i32_0 : i32, i32
  }
  func.func @transform_6(%arg0: i32) -> (i32, i32, i32) {
    %c0_i32 = arith.constant 0 : i32
    %c0_i32_0 = arith.constant 0 : i32
    %c0_i32_1 = arith.constant 0 : i32
    return %arg0, %c0_i32, %c0_i32_0 : i32, i32, i32
  }
}

</mosaic_0001>

<bundles_post_ra>
// kernel: tile.18
= control target key start
LH: loop header
LB: loop body
LE: loop exit
PB: predicated region body
PF: predicated region fallthrough
CT: control target
= control target key end

     0   :  { %s28_s0 = inlined_call_operand.vmem [shape: f32[8], index: 0, kind: input, shape index: {}]   ;;  %s29_s1 = inlined_call_operand.vmem [shape: f32[16,8], index: 1, kind: output, shape index: {}]  }
   0x1   :  { %v4_v0 = vld [vmem:[%s28_s0] ss:$0 sm:$0xff] }
   0x2   :  { %5 = vst [vmem:[%s29_s1] sm:$0xff] %v4_v0  ;;  %8 = vst [vmem:[%s29_s1 + $0x8] sm:$0xff] %v4_v0 }

// kernel: tile.19
= control target key start
LH: loop header
LB: loop body
LE: loop exit
PB: predicated region body
PF: predicated region fallthrough
CT: control target
= control target key end

     0   :  { %s131_s10 = smov 120   ;;  %s132_s11 = smov 104   ;;  %vm3_vm0 = vcmask 64512   ;;  %vm9_vm1 = vcmask 1048512   ;;  %vm15_vm2 = vcmask 982912   ;;  %vm21_vm3 = vcmask 917312   ;;  %s207_s0 = inlined_call_operand.vmem [shape: f32[16,8], index: 0, kind: input, shape index: {}]   ;;  %s208_s1 = inlined_call_operand.vmem [shape: f32[1,128], index: 1, kind: output, shape index: {}]  }
   0x1   :  { %v101_v0 = vld [vmem:[%s207_s0 + $0xf] sm:$0x1]   ;;  %v103_v1 = vld [vmem:[%s207_s0 + $0xd] sm:$0x1]   ;;  %v102_v2 = vld [vmem:[%s207_s0 + $0xe] sm:$0x1]  }
   0x2   :  { %7 = vrot.lane.b32.xlu0 %v101_v0, %s131_s10  ;;  %19 = vrot.lane.b32.xlu1 %v103_v1, %s132_s11  ;;  %v104_v3 = vld [vmem:[%s207_s0 + $0xc] sm:$0x1]   ;;  %s133_s16 = smov 112   ;;  %s134_s17 = smov 96   ;;  %v105_v4 = vld [vmem:[%s207_s0 + $0xb] sm:$0x1]  }
   0x3   :  { %v106_v5 = vld [vmem:[%s207_s0 + $0xa] sm:$0x1]   ;;  %v2_v6 = vld [vmem:[%s207_s0] sm:$0x1]   ;;  %s135_s24 = smov 88   ;;  %s136_s25 = smov 80  }
   0x4   :  { %4 = vst.msk [vmem:[#allocation0] sm:$0x1] %vm3_vm0, %v2_v6   ;;  %v107_v7 = vld [vmem:[%s207_s0 + $0x9] sm:$0x1]   ;;  %v108_v8 = vld [vmem:[%s207_s0 + $0x8] sm:$0x1]  }
   0x5   :  { %s137_s30 = smov 72   ;;  %s138_s2 = smov 64   ;;  %v109_v9 = vld [vmem:[%s207_s0 + $0x7] sm:$0x1]   ;;  %v110_v10 = vld [vmem:[%s207_s0 + $0x6] sm:$0x1]  }
   0x6   :  { %13 = vrot.lane.b32.xlu0 %v102_v2, %s133_s16  ;;  %25 = vrot.lane.b32.xlu1 %v104_v3, %s134_s17  ;;  %s139_s7 = smov 56   ;;  %s140_s8 = smov 48   ;;  %v111_v11 = vld [vmem:[%s207_s0 + $0x5] sm:$0x1]   ;;  %v112_v12 = vld [vmem:[%s207_s0 + $0x4] sm:$0x1]  }
   0x7   :  { %s141_s13 = smov 40   ;;  %s142_s14 = smov 32   ;;  %v113_v13 = vld [vmem:[%s207_s0 + $0x3] sm:$0x1]   ;;  %v114_v14 = vld [vmem:[%s207_s0 + $0x2] sm:$0x1]  }
   0x8   :  { %s143_s19 = smov 24   ;;  %s144_s20 = smov 16   ;;  %v115_v15 = vld [vmem:[%s207_s0 + $0x1] sm:$0x1]   ;;  %vm27_vm4 = vcmask 851712   ;;  %vm33_vm5 = vcmask 786112  }
   0x9   :  { %s145_s0 = smov 8   ;;  %vm39_vm6 = vcmask 720512   ;;  %vm45_vm7 = vcmask 654912   ;;  %vm51_vm8 = vcmask 589312   ;;  %vm57_vm9 = vcmask 523712  }
   0xa   :  { %31 = vrot.lane.b32.xlu0 %v105_v4, %s135_s24  ;;  %37 = vrot.lane.b32.xlu1 %v106_v5, %s136_s25  ;;  %vm63_vm10 = vcmask 458112   ;;  %vm69_vm11 = vcmask 392512   ;;  %vm75_vm12 = vcmask 326912   ;;  %vm81_vm13 = vcmask 261312  }
   0xb   :  { %vm87_vm14 = vcmask 195712   ;;  %vm93_vm15 = vcmask 130112  }
   0xe   :  { %43 = vrot.lane.b32.xlu0 %v107_v7, %s137_s30  ;;  %49 = vrot.lane.b32.xlu1 %v108_v8, %s138_s2 }
  0x12   :  { %55 = vrot.lane.b32.xlu0 %v109_v9, %s139_s7  ;;  %61 = vrot.lane.b32.xlu1 %v110_v10, %s140_s8 }
  0x16   :  { %67 = vrot.lane.b32.xlu0 %v111_v11, %s141_s13  ;;  %73 = vrot.lane.b32.xlu1 %v112_v12, %s142_s14 }
  0x1a   :  { %79 = vrot.lane.b32.xlu0 %v113_v13, %s143_s19  ;;  %85 = vrot.lane.b32.xlu1 %v114_v14, %s144_s20 }
  0x1e   :  { %91 = vrot.lane.b32.xlu0 %v115_v15, %s145_s0 }
  0x74   :  { %v8_v16 = vpop.permute.xlu0 %7   ;;  %v20_v17 = vpop.permute.xlu1 %19  }
  0x75   :  { %10 = vst.msk [vmem:[#allocation0] sm:$0x1] %vm9_vm1, %v8_v16  }
  0x78   :  { %v14_v18 = vpop.permute.xlu0 %13   ;;  %v26_v19 = vpop.permute.xlu1 %25  }
  0x79   :  { %16 = vst.msk [vmem:[#allocation0] sm:$0x1] %vm15_vm2, %v14_v18  }
  0x7a   :  { %22 = vst.msk [vmem:[#allocation0] sm:$0x1] %vm21_vm3, %v20_v17  }
  0x7b   :  { %28 = vst.msk [vmem:[#allocation0] sm:$0x1] %vm27_vm4, %v26_v19  }
  0x7c   :  { %v32_v20 = vpop.permute.xlu0 %31   ;;  %v38_v21 = vpop.permute.xlu1 %37  }
  0x7d   :  { %34 = vst.msk [vmem:[#allocation0] sm:$0x1] %vm33_vm5, %v32_v20  }
  0x7e   :  { %40 = vst.msk [vmem:[#allocation0] sm:$0x1] %vm39_vm6, %v38_v21  }
  0x80   :  { %v44_v22 = vpop.permute.xlu0 %43   ;;  %v50_v23 = vpop.permute.xlu1 %49  }
  0x81   :  { %46 = vst.msk [vmem:[#allocation0] sm:$0x1] %vm45_vm7, %v44_v22  }
  0x82   :  { %52 = vst.msk [vmem:[#allocation0] sm:$0x1] %vm51_vm8, %v50_v23  }
  0x84   :  { %v56_v24 = vpop.permute.xlu0 %55   ;;  %v62_v25 = vpop.permute.xlu1 %61  }
  0x85   :  { %58 = vst.msk [vmem:[#allocation0] sm:$0x1] %vm57_vm9, %v56_v24  }
  0x86   :  { %64 = vst.msk [vmem:[#allocation0] sm:$0x1] %vm63_vm10, %v62_v25  }
  0x88   :  { %v68_v26 = vpop.permute.xlu0 %67   ;;  %v74_v27 = vpop.permute.xlu1 %73  }
  0x89   :  { %70 = vst.msk [vmem:[#allocation0] sm:$0x1] %vm69_vm11, %v68_v26  }
  0x8a   :  { %76 = vst.msk [vmem:[#allocation0] sm:$0x1] %vm75_vm12, %v74_v27  }
  0x8c   :  { %v80_v28 = vpop.permute.xlu0 %79   ;;  %v86_v29 = vpop.permute.xlu1 %85  }
  0x8d   :  { %82 = vst.msk [vmem:[#allocation0] sm:$0x1] %vm81_vm13, %v80_v28  }
  0x8e   :  { %88 = vst.msk [vmem:[#allocation0] sm:$0x1] %vm87_vm14, %v86_v29  }
  0x90   :  { %v92_v30 = vpop.permute.xlu0 %91  }
  0x91   :  { %94 = vst.msk [vmem:[#allocation0] sm:$0x1] %vm93_vm15, %v92_v30  }
  0x98   :  { %v98_v31 = vld [vmem:[#allocation0] sm:$0x1] }
  0x99   :  { %100 = vst [vmem:[%s208_s1] sm:$0x1] %v98_v31 }

// kernel: tile.13
= control target key start
LH: loop header
LB: loop body
LE: loop exit
PB: predicated region body
PF: predicated region fallthrough
CT: control target
= control target key end

     0   :  { %s28_s0 = inlined_call_operand.vmem [shape: f32[4], index: 0, kind: input, shape index: {}]   ;;  %s29_s1 = inlined_call_operand.vmem [shape: f32[16,4], index: 1, kind: output, shape index: {}]  }
   0x1   :  { %v4_v0 = vld [vmem:[%s28_s0] ss:$0 sm:$0xff] }
   0x2   :  { %5 = vst [vmem:[%s29_s1] sm:$0xff] %v4_v0  ;;  %8 = vst [vmem:[%s29_s1 + $0x8] sm:$0xff] %v4_v0 }

// kernel: tile.14
= control target key start
LH: loop header
LB: loop body
LE: loop exit
PB: predicated region body
PF: predicated region fallthrough
CT: control target
= control target key end

     0   :  { %s131_s10 = smov 60   ;;  %s132_s11 = smov 52   ;;  %vm3_vm0 = vcmask 31744   ;;  %vm9_vm1 = vcmask 523744   ;;  %vm15_vm2 = vcmask 490944   ;;  %vm21_vm3 = vcmask 458144   ;;  %s207_s0 = inlined_call_operand.vmem [shape: f32[16,4], index: 0, kind: input, shape index: {}]   ;;  %s208_s1 = inlined_call_operand.vmem [shape: f32[1,64], index: 1, kind: output, shape index: {}]  }
   0x1   :  { %v101_v0 = vld [vmem:[%s207_s0 + $0xf] sm:$0x1]   ;;  %v103_v1 = vld [vmem:[%s207_s0 + $0xd] sm:$0x1]   ;;  %v102_v2 = vld [vmem:[%s207_s0 + $0xe] sm:$0x1]  }
   0x2   :  { %7 = vrot.lane.b32.xlu0 %v101_v0, %s131_s10  ;;  %19 = vrot.lane.b32.xlu1 %v103_v1, %s132_s11  ;;  %v104_v3 = vld [vmem:[%s207_s0 + $0xc] sm:$0x1]   ;;  %s133_s16 = smov 56   ;;  %s134_s17 = smov 48   ;;  %v105_v4 = vld [vmem:[%s207_s0 + $0xb] sm:$0x1]  }
   0x3   :  { %v106_v5 = vld [vmem:[%s207_s0 + $0xa] sm:$0x1]   ;;  %v2_v6 = vld [vmem:[%s207_s0] sm:$0x1]   ;;  %s135_s24 = smov 44   ;;  %s136_s25 = smov 40  }
   0x4   :  { %4 = vst.msk [vmem:[#allocation0] sm:$0x1] %vm3_vm0, %v2_v6   ;;  %v107_v7 = vld [vmem:[%s207_s0 + $0x9] sm:$0x1]   ;;  %v108_v8 = vld [vmem:[%s207_s0 + $0x8] sm:$0x1]  }
   0x5   :  { %s137_s30 = smov 36   ;;  %s138_s2 = smov 32   ;;  %v109_v9 = vld [vmem:[%s207_s0 + $0x7] sm:$0x1]   ;;  %v110_v10 = vld [vmem:[%s207_s0 + $0x6] sm:$0x1]  }
   0x6   :  { %13 = vrot.lane.b32.xlu0 %v102_v2, %s133_s16  ;;  %25 = vrot.lane.b32.xlu1 %v104_v3, %s134_s17  ;;  %s139_s7 = smov 28   ;;  %s140_s8 = smov 24   ;;  %v111_v11 = vld [vmem:[%s207_s0 + $0x5] sm:$0x1]   ;;  %v112_v12 = vld [vmem:[%s207_s0 + $0x4] sm:$0x1]  }
   0x7   :  { %s141_s13 = smov 20   ;;  %s142_s14 = smov 16   ;;  %v113_v13 = vld [vmem:[%s207_s0 + $0x3] sm:$0x1]   ;;  %v114_v14 = vld [vmem:[%s207_s0 + $0x2] sm:$0x1]  }
   0x8   :  { %s143_s19 = smov 12   ;;  %s144_s20 = smov 8   ;;  %v115_v15 = vld [vmem:[%s207_s0 + $0x1] sm:$0x1]   ;;  %vm27_vm4 = vcmask 425344   ;;  %vm33_vm5 = vcmask 392544  }
   0x9   :  { %s145_s0 = smov 4   ;;  %vm39_vm6 = vcmask 359744   ;;  %vm45_vm7 = vcmask 326944   ;;  %vm51_vm8 = vcmask 294144   ;;  %vm57_vm9 = vcmask 261344  }
   0xa   :  { %31 = vrot.lane.b32.xlu0 %v105_v4, %s135_s24  ;;  %37 = vrot.lane.b32.xlu1 %v106_v5, %s136_s25  ;;  %vm63_vm10 = vcmask 228544   ;;  %vm69_vm11 = vcmask 195744   ;;  %vm75_vm12 = vcmask 162944   ;;  %vm81_vm13 = vcmask 130144  }
   0xb   :  { %vm87_vm14 = vcmask 97344   ;;  %vm93_vm15 = vcmask 64544  }
   0xe   :  { %43 = vrot.lane.b32.xlu0 %v107_v7, %s137_s30  ;;  %49 = vrot.lane.b32.xlu1 %v108_v8, %s138_s2 }
  0x12   :  { %55 = vrot.lane.b32.xlu0 %v109_v9, %s139_s7  ;;  %61 = vrot.lane.b32.xlu1 %v110_v10, %s140_s8 }
  0x16   :  { %67 = vrot.lane.b32.xlu0 %v111_v11, %s141_s13  ;;  %73 = vrot.lane.b32.xlu1 %v112_v12, %s142_s14 }
  0x1a   :  { %79 = vrot.lane.b32.xlu0 %v113_v13, %s143_s19  ;;  %85 = vrot.lane.b32.xlu1 %v114_v14, %s144_s20 }
  0x1e   :  { %91 = vrot.lane.b32.xlu0 %v115_v15, %s145_s0 }
  0x74   :  { %v8_v16 = vpop.permute.xlu0 %7   ;;  %v20_v17 = vpop.permute.xlu1 %19  }
  0x75   :  { %10 = vst.msk [vmem:[#allocation0] sm:$0x1] %vm9_vm1, %v8_v16  }
  0x78   :  { %v14_v18 = vpop.permute.xlu0 %13   ;;  %v26_v19 = vpop.permute.xlu1 %25  }
  0x79   :  { %16 = vst.msk [vmem:[#allocation0] sm:$0x1] %vm15_vm2, %v14_v18  }
  0x7a   :  { %22 = vst.msk [vmem:[#allocation0] sm:$0x1] %vm21_vm3, %v20_v17  }
  0x7b   :  { %28 = vst.msk [vmem:[#allocation0] sm:$0x1] %vm27_vm4, %v26_v19  }
  0x7c   :  { %v32_v20 = vpop.permute.xlu0 %31   ;;  %v38_v21 = vpop.permute.xlu1 %37  }
  0x7d   :  { %34 = vst.msk [vmem:[#allocation0] sm:$0x1] %vm33_vm5, %v32_v20  }
  0x7e   :  { %40 = vst.msk [vmem:[#allocation0] sm:$0x1] %vm39_vm6, %v38_v21  }
  0x80   :  { %v44_v22 = vpop.permute.xlu0 %43   ;;  %v50_v23 = vpop.permute.xlu1 %49  }
  0x81   :  { %46 = vst.msk [vmem:[#allocation0] sm:$0x1] %vm45_vm7, %v44_v22  }
  0x82   :  { %52 = vst.msk [vmem:[#allocation0] sm:$0x1] %vm51_vm8, %v50_v23  }
  0x84   :  { %v56_v24 = vpop.permute.xlu0 %55   ;;  %v62_v25 = vpop.permute.xlu1 %61  }
  0x85   :  { %58 = vst.msk [vmem:[#allocation0] sm:$0x1] %vm57_vm9, %v56_v24  }
  0x86   :  { %64 = vst.msk [vmem:[#allocation0] sm:$0x1] %vm63_vm10, %v62_v25  }
  0x88   :  { %v68_v26 = vpop.permute.xlu0 %67   ;;  %v74_v27 = vpop.permute.xlu1 %73  }
  0x89   :  { %70 = vst.msk [vmem:[#allocation0] sm:$0x1] %vm69_vm11, %v68_v26  }
  0x8a   :  { %76 = vst.msk [vmem:[#allocation0] sm:$0x1] %vm75_vm12, %v74_v27  }
  0x8c   :  { %v80_v28 = vpop.permute.xlu0 %79   ;;  %v86_v29 = vpop.permute.xlu1 %85  }
  0x8d   :  { %82 = vst.msk [vmem:[#allocation0] sm:$0x1] %vm81_vm13, %v80_v28  }
  0x8e   :  { %88 = vst.msk [vmem:[#allocation0] sm:$0x1] %vm87_vm14, %v86_v29  }
  0x90   :  { %v92_v30 = vpop.permute.xlu0 %91  }
  0x91   :  { %94 = vst.msk [vmem:[#allocation0] sm:$0x1] %vm93_vm15, %v92_v30  }
  0x98   :  { %v98_v31 = vld [vmem:[#allocation0] sm:$0x1] }
  0x99   :  { %100 = vst [vmem:[%s208_s1] sm:$0x1] %v98_v31 }

// kernel: temporal_context_module.1
= control target key start
LH: loop header
LB: loop body
LE: loop exit
PB: predicated region body
PF: predicated region fallthrough
CT: control target
= control target key end

     0   :  { %s1935_s21 = smov 0   ;;  %s2356_s0 = inlined_call_operand.vmem [shape: f32[2,5,16,128], index: 0, kind: input, shape index: {}]   ;;  %s2357_s1 = inlined_call_operand.vmem [shape: f32[2,16,128], index: 1, kind: input, shape index: {}]   ;;  %s2358_s2 = inlined_call_operand.vmem [shape: bf16[128,64], index: 2, kind: input, shape index: {}]   ;;  %s2359_s3 = inlined_call_operand.vmem [shape: f32[1,64], index: 3, kind: input, shape index: {}]   ;;  %s2360_s4 = inlined_call_operand.vmem [shape: bf16[1152,128], index: 4, kind: input, shape index: {}]   ;;  %s2361_s5 = inlined_call_operand.vmem [shape: f32[1,128], index: 5, kind: input, shape index: {}]   ;;  %s2362_s6 = inlined_call_operand.vmem [shape: f32[2,16,128], index: 6, kind: output, shape index: {}]  }
   0x1 LB: > { %s1542_s22 = sadd.s32 4294967295, %s1895_s21   ;;  %p1546_p0 = scmp.ge.s32.totalorder %s1895_s21, 1  ;;  %s1895_s21 = sphi %s1935_s21, %s16_s21  }
   0x2   : > { %p222_p1 = scmp.lt.s32.totalorder %s1895_s21, 3 }
   0x4   : > { %p223_p2 = pnand %p1546_p0, %p222_p1 }
   0x5   : > { %v1809_v0 = vld [vmem:[%s2358_s2] sm:$0xff] (!%p223_p2)   ;;  %p257_p3 = scmp.lt.s32.totalorder (!%p223_p2), %s1542_s22, 1  ;;  %v1810_v1 = vld [vmem:[%s2358_s2 + $0x8] sm:$0xff] (!%p223_p2)   ;;  %v1811_v2 = vld [vmem:[%s2358_s2 + $0x10] sm:$0xff] (!%p223_p2)   ;;  %vm503_vm0 = vcmask (!%p223_p2), 1040384   ;;  %s1897_s26 = smov (!%p223_p2), 64  }
   0x6   : > { %226 = sbr.rel (%p223_p2) target bundleno = 668 (0x29c), region = 44  ;;  %1749 = vmatprep.subr.bf16.mxu0 (!%p223_p2), %v1809_v0  ;;  %v1812_v3 = vld [vmem:[%s2358_s2 + $0x18] sm:$0xff] (!%p223_p2)   ;;  %v1813_v7 = vld [vmem:[%s2358_s2 + $0x20] sm:$0xff] (!%p223_p2)   ;;  %v1814_v8 = vld [vmem:[%s2358_s2 + $0x28] sm:$0xff] (!%p223_p2)   ;;  %vm504_vm1 = vsmask.f32 (!%p223_p2), 256 }
   0x7   : > { %1750 = vmatpush3.bf16.msra.mxu0 (!%p223_p2), %v1809_v0  ;;  %v1815_v9 = vld [vmem:[%s2358_s2 + $0x30] sm:$0xff] (!%p223_p2)   ;;  %v1816_v10 = vld [vmem:[%s2358_s2 + $0x38] sm:$0xff] (!%p223_p2)   ;;  %v1817_v26 = vld [vmem:[%s2360_s4 + $0x40] sm:$0xff] (!%p223_p2)   ;;  %vm518_vm3 = vsmask.f32 (!%p223_p2), 7424  ;;  %vm535_vm4 = vcmask (!%p223_p2), 1046528  }
   0x8   : > { %1751 = vmatprep.subr.bf16.mxu0 (!%p223_p2), %v1810_v1  ;;  %v1818_v27 = vld [vmem:[%s2360_s4] sm:$0xff] (!%p223_p2)   ;;  %v1819_v28 = vld [vmem:[%s2360_s4 + $0x48] sm:$0xff] (!%p223_p2)   ;;  %1652 = vmatprep.subr.bf16.mxu1 (!%p223_p2), %v1817_v26  ;;  %v1821_v33 = vld [vmem:[%s2360_s4 + $0x50] sm:$0xff] (!%p223_p2)   ;;  %vm622_vm5 = vcmask (!%p223_p2), 523264   ;;  %vm1899_vm6 = vmmov (!%p223_p2), 0  }
   0x9   : > { %v1824_v29 = vld [vmem:[%s2360_s4 + $0xc0] sm:$0xff] (!%p223_p2)   ;;  %1653 = vmatpush3.bf16.msra.mxu1 (!%p223_p2), %v1818_v27  ;;  %v1820_v30 = vld [vmem:[%s2360_s4 + $0x8] sm:$0xff] (!%p223_p2)   ;;  %v1832_v35 = vld [vmem:[%s2360_s4 + $0xd0] sm:$0xff] (!%p223_p2)  }
   0xa   : > { %v1826_v31 = vld [vmem:[%s2360_s4 + $0x80] sm:$0xff] (!%p223_p2)   ;;  %v1828_v32 = vld [vmem:[%s2360_s4 + $0xc8] sm:$0xff] (!%p223_p2)   ;;  %1654 = vmatprep.subr.bf16.mxu1 (!%p223_p2), %v1819_v28  ;;  %v1822_v36 = vld [vmem:[%s2360_s4 + $0x10] sm:$0xff] (!%p223_p2)  }
   0xb   : > { %1752 = vmatpush3.bf16.msra.mxu0 (!%p223_p2), %v1810_v1  ;;  %v1830_v34 = vld [vmem:[%s2360_s4 + $0x88] sm:$0xff] (!%p223_p2)   ;;  %v1823_v37 = vld [vmem:[%s2360_s4 + $0x58] sm:$0xff] (!%p223_p2)   ;;  %v1834_v38 = vld [vmem:[%s2360_s4 + $0x90] sm:$0xff] (!%p223_p2)  }
   0xc   : > { %1753 = vmatprep.subr.bf16.mxu0 (!%p223_p2), %v1811_v2  ;;  %v1825_v39 = vld [vmem:[%s2360_s4 + $0x18] sm:$0xff] (!%p223_p2)   ;;  %v1827_v40 = vld [vmem:[%s2360_s4 + $0x60] sm:$0xff] (!%p223_p2)   ;;  %v1831_v42 = vld [vmem:[%s2360_s4 + $0x68] sm:$0xff] (!%p223_p2)  }
   0xd   : > { %s2366_s22 = smov (!%p257_p3, %s1542_s22), 1  ;;  %1655 = vmatpush3.bf16.msra.mxu1 %v1820_v30  ;;  %v1829_v41 = vld [vmem:[%s2360_s4 + $0x20] sm:$0xff]   ;;  %v1833_v43 = vld [vmem:[%s2360_s4 + $0x28] sm:$0xff]   ;;  %v1835_v46 = vld [vmem:[%s2360_s4 + $0x70] sm:$0xff]  }
   0xe   : > { %s1797_s29 = smul.u32 80, %s2366_s22  ;;  %s1636_s13 = sshll.u32 %s2366_s22, 4  ;;  %1656 = vmatprep.subr.bf16.mxu1 %v1821_v33  ;;  %v2048_v44 = vld [vmem:[%s2359_s3] ss:$0 sm:$0xff]  ;;  %v1836_v47 = vld [vmem:[%s2360_s4 + $0xd8] sm:$0xff]   ;;  %v1837_v48 = vld [vmem:[%s2360_s4 + $0x30] sm:$0xff]  }
   0xf   : > { %1754 = vmatpush3.bf16.msra.mxu0 %v1811_v2  ;;  %s266_s24 = scalar_lea.vmem %s2357_s1, %s1636_s13  ;;  %v1838_v51 = vld [vmem:[%s2360_s4 + $0x98] sm:$0xff]   ;;  %v1840_v53 = vld [vmem:[%s2360_s4 + $0xe0] sm:$0xff]   ;;  %v1843_v2 = vld [vmem:[%s2360_s4 + $0xe8] sm:$0xff]  }
  0x10   : > { %s1958_s8 = scalar_lea.vmem %s2356_s0, %s1797_s29  ;;  %1755 = vmatprep.subr.bf16.mxu0 %v1812_v3  ;;  %v283_v23 = vld [vmem:[%s266_s24] sm:$0xff]  ;;  %v284_v24 = vld [vmem:[%s266_s24 + $0x8] sm:$0xff]  ;;  %v1839_v52 = vld [vmem:[%s2360_s4 + $0x78] sm:$0xff]   ;;  %s271_s29 = scalar_lea.vmem %s2362_s6, %s1636_s13 }
  0x11   : > { %v273_v4 = vld [vmem:[%s1958_s8] sm:$0xff]  ;;  %v274_v5 = vld [vmem:[%s1958_s8 + $0x8] sm:$0xff]  ;;  %v275_v11 = vld [vmem:[%s1958_s8 + $0x10] sm:$0xff]  ;;  %v290_v25 = vpack.c.bf16 %v284_v24, %v283_v23  ;;  %1657 = vmatpush3.bf16.msra.mxu1 %v1822_v36 }
  0x12   : > { %v285_v6 = vpack.c.bf16 %v274_v5, %v273_v4  ;;  %v276_v12 = vld [vmem:[%s1958_s8 + $0x18] sm:$0xff]  ;;  %v277_v13 = vld [vmem:[%s1958_s8 + $0x20] sm:$0xff]  ;;  %v278_v14 = vld [vmem:[%s1958_s8 + $0x28] sm:$0xff]  ;;  %1658 = vmatprep.subr.bf16.mxu1 %v1823_v37 }
  0x13   : > { %1756 = vmatpush3.bf16.msra.mxu0 %v1812_v3  ;;  %v286_v15 = vpack.c.bf16 %v276_v12, %v275_v11  ;;  %v287_v16 = vpack.c.bf16 %v278_v14, %v277_v13  ;;  %v279_v17 = vld [vmem:[%s1958_s8 + $0x30] sm:$0xff]  ;;  %v280_v18 = vld [vmem:[%s1958_s8 + $0x38] sm:$0xff]  ;;  %v281_v19 = vld [vmem:[%s1958_s8 + $0x40] sm:$0xff] }
  0x14   : > { %1765 = vmatprep.mubr.bf16.mxu0 %v285_v6  ;;  %1757 = vmatprep.subr.bf16.mxu0 %v1813_v7  ;;  %v282_v20 = vld [vmem:[%s1958_s8 + $0x48] sm:$0xff]  ;;  %v288_v21 = vpack.c.bf16 %v280_v18, %v279_v17  ;;  %v1841_v57 = vld [vmem:[%s2360_s4 + $0x38] sm:$0xff]   ;;  %v1842_v60 = vld [vmem:[%s2360_s4 + $0xa0] sm:$0xff]  }
  0x15   : > { %v289_v22 = vpack.c.bf16 %v282_v20, %v281_v19  ;;  %1659 = vmatpush3.bf16.msra.mxu1 %v1825_v39  ;;  %v1844_v3 = vld [vmem:[%s2360_s4 + $0x140] sm:$0xff]   ;;  %vm2084_vm2 = vmand %vm503_vm0, %vm504_vm1  ;;  %v1845_v13 = vld [vmem:[%s2360_s4 + $0xa8] sm:$0xff]  }
  0x16   : > { %1660 = vmatprep.subr.bf16.mxu1 %v1827_v40 }
  0x17   : > { %1758 = vmatpush3.bf16.msra.mxu0 %v1813_v7 }
  0x18   : > { %1759 = vmatprep.subr.bf16.mxu0 %v1814_v8 }
  0x19   : > { %1661 = vmatpush3.bf16.msra.mxu1 %v1829_v41 }
  0x1a   : > { %1662 = vmatprep.subr.bf16.mxu1 %v1831_v42 }
  0x1b   : > { %1760 = vmatpush3.bf16.msra.mxu0 %v1814_v8 }
  0x1c   : > { %1761 = vmatprep.subr.bf16.mxu0 %v1815_v9 }
  0x1d   : > { %1663 = vmatpush3.bf16.msra.mxu1 %v1833_v43 }
  0x1e   : > { %1664 = vmatprep.subr.bf16.mxu1 %v1835_v46 }
  0x1f   : > { %1762 = vmatpush3.bf16.msra.mxu0 %v1815_v9 }
  0x20   : > { %1763 = vmatprep.subr.bf16.mxu0 %v1816_v10 }
  0x21   : > { %1665 = vmatpush3.bf16.msra.mxu1 %v1837_v48 }
  0x22   : > { %1666 = vmatprep.subr.bf16.mxu1 %v1839_v52 }
  0x23   : > { %1764 = vmatpush3.bf16.msra.mxu0 %v1816_v10 }
  0x24   : > { %1674 = vmatprep.subr.bf16.mxu0 %v1824_v29 }
  0x25   : > { %1667 = vmatpush3.bf16.msra.mxu1 %v1841_v57 }
  0x26   : > { %1766 = vmatmul.mubr.bf16.vlgmr.msra.gmra.mrb[0].mxu0 %v286_v15  ;;  %1696 = vmatprep.subr.bf16.mxu1 %v1844_v3 }
  0x27   : > { %1769 = vmatprep.mubr.bf16.mxu0 %v287_v16  ;;  %1675 = vmatpush3.bf16.msra.mxu0 %v1826_v31 }
  0x28   : > { %1676 = vmatprep.subr.bf16.mxu0 %v1828_v32 }
  0x2b   : > { %1677 = vmatpush3.bf16.msra.mxu0 %v1830_v34 }
  0x2c   : > { %1678 = vmatprep.subr.bf16.mxu0 %v1832_v35 }
  0x2e   : > { %1770 = vmatmul.mubr.bf16.gmra.mrb[4].mxu0 %v288_v21  ;;  %v1847_v21 = vld [vmem:[%s2360_s4 + $0xf0] sm:$0xff]  }
  0x2f   : > { %1773 = vmatprep.mubr.bf16.mxu0 %v289_v22  ;;  %1679 = vmatpush3.bf16.msra.mxu0 %v1834_v38  ;;  %v1849_v22 = vld [vmem:[%s2360_s4 + $0xb0] sm:$0xff]   ;;  %v1851_v38 = vld [vmem:[%s2360_s4 + $0xf8] sm:$0xff]  }
  0x30   : > { %1680 = vmatprep.subr.bf16.mxu0 %v1836_v47 }
  0x33   : > { %1681 = vmatpush3.bf16.msra.mxu0 %v1838_v51 }
  0x34   : > { %1682 = vmatprep.subr.bf16.mxu0 %v1840_v53 }
  0x36   : > { %1774 = vmatmul.mubr.bf16.gmra.mrb[8].mxu0 %v290_v25 }
  0x37   : > { %1683 = vmatpush3.bf16.msra.mxu0 %v1842_v60 }
  0x38   : > { %1684 = vmatprep.subr.bf16.mxu0 %v1843_v2 }
  0x3b   : > { %1685 = vmatpush3.bf16.msra.mxu0 %v1845_v13 }
  0x3c   : > { %1686 = vmatprep.subr.bf16.mxu0 %v1847_v21 }
  0x3f   : > { %1687 = vmatpush3.bf16.msra.mxu0 %v1849_v22 }
  0x40   : > { %1688 = vmatprep.subr.bf16.mxu0 %v1851_v38 }
  0xf9   : > { %v1767_v45 = vpop.f32.mrb[0].mxu0 }
  0xfa   : > { %v396_v49 = vpop.f32.mrb[1].mxu0  ;;  %v405_v54 = vadd.f32 %v1767_v45, %v2048_v44  ;;  %v1853_v45 = vld [vmem:[%s2360_s4 + $0xb8] sm:$0xff]  }
  0xfb   : > { %v1768_v50 = vpop.f32.mrb[2].mxu0  ;;  %v397_v58 = vadd.f32 %v2048_v44, %v396_v49  ;;  %1689 = vmatpush3.bf16.msra.mxu0 %v1853_v45 }
  0xfc   : > { %v408_v55 = vadd.f32 %v1768_v50, %v2048_v44  ;;  %v399_v56 = vpop.f32.mrb[3].mxu0 }
  0xfd   : > { %v400_v59 = vadd.f32 %v2048_v44, %v399_v56 }
  0xfe   : > { %v444_v61 = vpack.c.bf16 %v408_v55, %v405_v54 }
  0xff   : > { %v443_v62 = vpack.c.bf16 %v400_v59, %v397_v58 }
 0x100   : > { %v457_v63 = vshrl.u32 %v444_v61, 16  ;;  %v460_v5 = vshll.u32 %v444_v61, 16 }
 0x101   : > { %v450_v0 = vshrl.u32 %v443_v62, 16  ;;  %v1771_v1 = vpop.f32.mrb[4].mxu0  ;;  %v453_v10 = vshll.u32 %v443_v62, 16 }
 0x102   : > { %v459_v4 = vrot.slane %v457_v63, 7  ;;  %v421_v7 = vadd.f32 %v1771_v1, %v2048_v44  ;;  %v412_v8 = vpop.f32.mrb[5].mxu0 }
 0x103   : > { %v452_v9 = vrot.slane %v450_v0, 7  ;;  %v413_v11 = vadd.f32 %v2048_v44, %v412_v8  ;;  %v1772_v12 = vpop.f32.mrb[6].mxu0  ;;  %v1856_v0 = vld [vmem:[%s2360_s4 + $0x1c0] sm:$0xff]  }
 0x104   : > { %v424_v14 = vadd.f32 %v1772_v12, %v2048_v44  ;;  %v415_v15 = vpop.f32.mrb[7].mxu0  ;;  %v462_v16 = vor.u32 %v460_v5, %v459_v4  ;;  %v2096_v17 = vsel %vm2084_vm2, %v459_v4, 0  ;;  %1718 = vmatprep.subr.bf16.mxu0 %v1856_v0  ;;  %v1848_v0 = vld [vmem:[%s2360_s4 + $0x148] sm:$0xff]  }
 0x105   : > { %v455_v18 = vor.u32 %v453_v10, %v452_v9  ;;  %v2100_v19 = vsel %vm2084_vm2, %v452_v9, 0  ;;  %v416_v20 = vadd.f32 %v2048_v44, %v415_v15  ;;  %v550_v29 = vshll.u32 %v2096_v17, 16 }
 0x106   : > { %v446_v23 = vpack.c.bf16 %v424_v14, %v421_v7  ;;  %v2111_v24 = vsel %vm2084_vm2, 0, %v462_v16  ;;  %v527_v28 = vshll.u32 %v2100_v19, 16  ;;  %v556_v37 = vrot.slane %v2096_v17, 1 }
 0x107   : > { %v2115_v25 = vsel %vm2084_vm2, 0, %v455_v18  ;;  %v445_v26 = vpack.c.bf16 %v416_v20, %v413_v11  ;;  %540 = vrot.lane.b32.xlu0 %v2111_v24, %s1897_s26  ;;  %v545_v27 = vshll.u32 %v2111_v24, 16  ;;  %v543_v35 = vshrl.u32 %v2111_v24, 16 }
 0x108   : > { %v471_v30 = vshrl.u32 %v446_v23, 16  ;;  %v474_v31 = vshll.u32 %v446_v23, 16  ;;  %v522_v32 = vshll.u32 %v2115_v25, 16  ;;  %v520_v42 = vshrl.u32 %v2115_v25, 16 }
 0x109   : > { %v464_v33 = vshrl.u32 %v445_v26, 16  ;;  %v467_v34 = vshll.u32 %v445_v26, 16  ;;  %v1775_v36 = vpop.f32.mrb[8].mxu0  ;;  %v2133_v47 = vrot.slane %v545_v27, 1  ;;  %v529_v50 = vrot.slane %v527_v28, 1 }
 0x10a   : > { %v473_v39 = vrot.slane %v471_v30, 7  ;;  %v437_v40 = vadd.f32 %v1775_v36, %v2048_v44  ;;  %v428_v41 = vpop.f32.mrb[9].mxu0  ;;  %v524_v43 = vrot.slane %v522_v32, 1  ;;  %v536_v59 = vrot.slane %v2115_v25, 1 }
 0x10b   : > { %v466_v46 = vrot.slane %v464_v33, 7  ;;  %v429_v48 = vadd.f32 %v2048_v44, %v428_v41  ;;  %v1776_v49 = vpop.f32.mrb[10].mxu0  ;;  %v537_v12 = vrot.slane %v2100_v19, 1  ;;  %v555_v21 = vrot.slane %v2111_v24, 1 }
 0x10c   : > { %v476_v51 = vor.u32 %v474_v31, %v473_v39  ;;  %v515_v52 = vsel %vm2084_vm2, %v473_v39, 0  ;;  %v440_v53 = vadd.f32 %v1776_v49, %v2048_v44  ;;  %v431_v54 = vpop.f32.mrb[11].mxu0  ;;  %v525_v55 = vor.u32 %v524_v43, %v520_v42 }
 0x10d   : > { %v469_v56 = vor.u32 %v467_v34, %v466_v46  ;;  %v432_v57 = vadd.f32 %v2048_v44, %v431_v54  ;;  %v596_v58 = vrot.slane %v515_v52, 1  ;;  %v514_v63 = vsel %vm2084_vm2, %v466_v46, 0 }
 0x10e   : > { %v2143_v60 = vsel %vm2084_vm2, 0, %v476_v51  ;;  %v448_v61 = vpack.c.bf16 %v440_v53, %v437_v40  ;;  %v530_v62 = vsel %vm518_vm3, %v525_v55, %v529_v50  ;;  %v568_v3 = vshll.u32 %v514_v63, 16 }
 0x10f   : > { %v2153_v44 = vsel %vm2084_vm2, 0, %v469_v56  ;;  %v447_v1 = vpack.c.bf16 %v432_v57, %v429_v48  ;;  %531 = vrot.lane.b32.xlu0 %v530_v62, %s1897_s26  ;;  %v595_v2 = vrot.slane %v2143_v60, 1  ;;  %v590_v13 = vshll.u32 %v515_v52, 16 }
 0x110   : > { %v485_v4 = vshrl.u32 %v448_v61, 16  ;;  %v488_v5 = vshll.u32 %v448_v61, 16  ;;  %v561_v7 = vshrl.u32 %v2153_v44, 16  ;;  %v563_v8 = vshll.u32 %v2153_v44, 16 }
 0x111   : > { %v478_v9 = vshrl.u32 %v447_v1, 16  ;;  %v481_v10 = vshll.u32 %v447_v1, 16  ;;  %v597_v11 = vsel %vm535_vm4, %v595_v2, %v596_v58  ;;  %v570_v16 = vrot.slane %v568_v3, 1  ;;  %v1850_v2 = vld [vmem:[%s2360_s4 + $0x108] sm:$0xff]  }
 0x112   : > { %v487_v14 = vrot.slane %v485_v4, 7  ;;  %v565_v15 = vrot.slane %v563_v8, 1  ;;  %v577_v20 = vrot.slane %v514_v63, 1  ;;  %v538_v22 = vsel %vm535_vm4, %v536_v59, %v537_v12  ;;  %v1852_v4 = vld [vmem:[%s2360_s4 + $0x150] sm:$0xff]   ;;  %v1855_v8 = vld [vmem:[%s2360_s4 + $0x158] sm:$0xff]  }
 0x113   : > { %v480_v18 = vrot.slane %v478_v9, 7  ;;  %598 = vrot.lane.b32.xlu0 %v597_v11, %s1897_s26  ;;  %v585_v19 = vshll.u32 %v2143_v60, 16  ;;  %v583_v32 = vshrl.u32 %v2143_v60, 16  ;;  %v592_v38 = vrot.slane %v590_v13, 1  ;;  %v1858_v11 = vld [vmem:[%s2360_s4 + $0x180] sm:$0xff]  }
 0x114   : > { %v490_v23 = vor.u32 %v488_v5, %v487_v14  ;;  %v2166_v26 = vsel %vm2084_vm2, %v487_v14, 0  ;;  %v566_v27 = vor.u32 %v565_v15, %v561_v7  ;;  %v548_v6 = vor.u32 %v2133_v47, %v543_v35  ;;  %v1859_v13 = vld [vmem:[%s2360_s4 + $0x160] sm:$0xff]  }
 0x115   : > { %v483_v28 = vor.u32 %v481_v10, %v480_v18  ;;  %v516_v30 = vsel %vm2084_vm2, %v480_v18, 0  ;;  %v660_v31 = vshll.u32 %v2166_v26, 16  ;;  %v587_v48 = vrot.slane %v585_v19, 1  ;;  %v1857_v10 = vld [vmem:[%s2360_s4 + $0x118] sm:$0xff]   ;;  %v1861_v15 = vld [vmem:[%s2360_s4 + $0x120] sm:$0xff]   ;;  %v1867_v19 = vld [vmem:[%s2360_s4 + $0x170] sm:$0xff]  }
 0x116   : > { %v2175_v33 = vsel %vm2084_vm2, 0, %v490_v23  ;;  %v617_v34 = vrot.slane %v516_v30, 1  ;;  %v571_v36 = vsel %vm518_vm3, %v566_v27, %v570_v16  ;;  %v608_v42 = vshll.u32 %v516_v30, 16  ;;  %v1862_v16 = vld [vmem:[%s2360_s4 + $0x188] sm:$0xff]   ;;  %v1866_v23 = vld [vmem:[%s2360_s4 + $0x190] sm:$0xff]  }
 0x117   : > { %v2180_v39 = vsel %vm2084_vm2, 0, %v483_v28  ;;  %572 = vrot.lane.b32.xlu1 %v571_v36, %s1897_s26  ;;  %v653_v40 = vshrl.u32 %v2175_v33, 16  ;;  %v655_v41 = vshll.u32 %v2175_v33, 16  ;;  %v662_v43 = vrot.slane %v660_v31, 1  ;;  %v1868_v28 = vld [vmem:[%s2360_s4 + $0x1d8] sm:$0xff]   ;;  %v1869_v31 = vld [vmem:[%s2360_s4 + $0x130] sm:$0xff]  }
 0x118   : > { %v601_v45 = vshrl.u32 %v2180_v39, 16  ;;  %v603_v46 = vshll.u32 %v2180_v39, 16  ;;  %v552_v50 = vrot.slane %v550_v29, 1  ;;  %v576_v51 = vrot.slane %v2153_v44, 1  ;;  %v1872_v36 = vld [vmem:[%s2360_s4 + $0x1e0] sm:$0xff]  }
 0x119   : > { %v657_v49 = vrot.slane %v655_v41, 1  ;;  %v557_v52 = vsel %vm535_vm4, %v555_v21, %v556_v37  ;;  %v588_v54 = vor.u32 %v587_v48, %v583_v32  ;;  %v616_v55 = vrot.slane %v2180_v39, 1  ;;  %v1864_v21 = vld [vmem:[%s2360_s4 + $0x1d0] sm:$0xff]   ;;  %v1870_v32 = vld [vmem:[%s2360_s4 + $0x198] sm:$0xff]   ;;  %v1875_v41 = vld [vmem:[%s2360_s4 + $0x1e8] sm:$0xff]  }
 0x11a   : > { %v605_v53 = vrot.slane %v603_v46, 1  ;;  %v610_v57 = vrot.slane %v608_v42, 1  ;;  %v553_v24 = vsel %vm518_vm3, %v548_v6, %v552_v50  ;;  %v2200_v35 = vsel %vm535_vm4, %v576_v51, %v577_v20  ;;  %v1863_v20 = vld [vmem:[%s2360_s4 + $0x168] sm:$0xff]   ;;  %v1878_v46 = vld [vmem:[%s2360_s4 + $0x1f0] sm:$0xff]   ;;  %v1881_v51 = vld [vmem:[%s2360_s4 + $0x1f8] sm:$0xff]  }
 0x11b   : > { %558 = vrot.lane.b32.xlu1 %v557_v52, %s1897_s26  ;;  %v658_v56 = vor.u32 %v657_v49, %v653_v40  ;;  %v593_v47 = vsel %vm518_vm3, %v588_v54, %v592_v38  ;;  %v618_v17 = vsel %vm535_vm4, %v616_v55, %v617_v34  ;;  %v664_v59 = vshrl.u32 %v2166_v26, 16  ;;  %v1871_v34 = vld [vmem:[%s2360_s4 + $0x178] sm:$0xff]   ;;  %v1874_v40 = vld [vmem:[%s2360_s4 + $0x1a0] sm:$0xff]   ;;  %v1876_v42 = vld [vmem:[%s2360_s4 + $0x1a8] sm:$0xff]  }
 0x11c   : > { %v606_v29 = vor.u32 %v605_v53, %v601_v45  ;;  %v1873_v38 = vld [vmem:[%s2360_s4 + $0x138] sm:$0xff]   ;;  %v1898_v45 = vmov 0.0   ;;  %v1879_v49 = vld [vmem:[%s2360_s4 + $0x1b0] sm:$0xff]   ;;  %v1880_v6 = vld [vmem:[%s2360_s4 + $0x208] sm:$0xff]  }
 0x11d   : > { %v663_v37 = vsel %vm518_vm3, %v658_v56, %v662_v43  ;;  %v1877_v43 = vld [vmem:[%s2360_s4 + $0x200] sm:$0xff]   ;;  %v1882_v52 = vld [vmem:[%s2360_s4 + $0x1b8] sm:$0xff]   ;;  %v1883_v53 = vld [vmem:[%s2360_s4 + $0x210] sm:$0xff]  }
 0x11e   : > { %666 = vrot.lane.b32.xlu0 %v663_v37, %s1897_s26  ;;  %v611_v58 = vsel %vm518_vm3, %v606_v29, %v610_v57  ;;  %v1884_v55 = vld [vmem:[%s2360_s4 + $0x218] sm:$0xff]   ;;  %v1885_v57 = vld [vmem:[%s2360_s4 + $0x220] sm:$0xff]  }
 0x11f   : > { %580 = vrot.lane.b32.xlu1 %v2143_v60, %s1897_s26  ;;  %v1846_v60 = vld [vmem:[%s2360_s4 + $0x100] sm:$0xff]  }
 0x122   : > { %612 = vrot.lane.b32.xlu0 %v611_v58, %s1897_s26 }
 0x123   : > { %620 = vrot.lane.b32.xlu1 %v2175_v33, %s1897_s26 }
 0x127   : > { %668 = vrot.lane.b32.xlu1 %v664_v59, %s1897_s26  ;;  %v1888_v59 = vld [vmem:[%s2360_s4 + $0x238] sm:$0xff]  }
 0x179   : > { %v541_v61 = vpop.permute.xlu0 %540 }
 0x17a   : > { %v628_v62 = vsel %vm622_vm5, %v538_v22, %v541_v61  ;;  %v1865_v22 = vld [vmem:[%s2360_s4 + $0x128] sm:$0xff]  }
 0x17b   : > { %1300 = vmatprep.mubr.bf16.mxu1 %v628_v62 }
 0x181   : > { %v532_v63 = vpop.permute.xlu0 %531 }
 0x182   : > { %v624_v1 = vsel %vm622_vm5, %v2115_v25, %v532_v63  ;;  %v1854_v25 = vld [vmem:[%s2360_s4 + $0x110] sm:$0xff]  }
 0x183   : > { %1301 = vmatmul.mubr.bf16.vlgmr.msra.gmra.mrb[0].mxu1 %v624_v1 }
 0x184   : > { %1697 = vmatpush3.bf16.msra.mxu1 %v1846_v60 }
 0x185   : > { %v599_v3 = vpop.permute.xlu0 %598  ;;  %1698 = vmatprep.subr.bf16.mxu1 %v1848_v0 }
 0x186   : > { %v643_v5 = vsel %vm622_vm5, %v593_v47, %v599_v3 }
 0x187   : > { %1382 = vmatprep.mubr.bf16.mxu1 %v643_v5 }
 0x188   : > { %1699 = vmatpush3.bf16.msra.mxu1 %v1850_v2 }
 0x189   : > { %v573_v7 = vpop.permute.xlu1 %572  ;;  %1700 = vmatprep.subr.bf16.mxu1 %v1852_v4  ;;  %v1561_v4 = vld [vmem:[%s2361_s5] ss:$0 sm:$0xff] }
 0x18a   : > { %v635_v9 = vsel %vm622_vm5, %v2153_v44, %v573_v7  ;;  %v1860_v44 = vld [vmem:[%s2360_s4 + $0x1c8] sm:$0xff]  }
 0x18b   : > { %1341 = vmatprep.mubr.bf16.mxu0 %v635_v9 }
 0x18c   : > { %1701 = vmatpush3.bf16.msra.mxu1 %v1854_v25 }
 0x18d   : > { %v559_v12 = vpop.permute.xlu1 %558  ;;  %1702 = vmatprep.subr.bf16.mxu1 %v1855_v8 }
 0x18e   : > { %v632_v14 = vsel %vm622_vm5, %v553_v24, %v559_v12 }
 0x18f   : > { %1342 = vmatmul.mubr.bf16.vlgmr.msra.gmra.mrb[12].mxu0 %v632_v14 }
 0x190   : > { %1703 = vmatpush3.bf16.msra.mxu1 %v1857_v10  ;;  %1719 = vmatpush3.bf16.msra.mxu0 %v1858_v11  ;;  %v667_v50 = vpop.permute.xlu0 %666 }
 0x191   : > { %v581_v18 = vpop.permute.xlu1 %580  ;;  %1704 = vmatprep.subr.bf16.mxu1 %v1859_v13  ;;  %1720 = vmatprep.subr.bf16.mxu0 %v1860_v44  ;;  %v671_v29 = vsel %vm622_vm5, %v2175_v33, %v667_v50 }
 0x192   : > { %v639_v48 = vsel %vm622_vm5, %v2200_v35, %v581_v18  ;;  %v1886_v35 = vld [vmem:[%s2360_s4 + $0x228] sm:$0xff]   ;;  %v676_v47 = vshll.u32 %v671_v29, 16  ;;  %v674_v33 = vshrl.u32 %v671_v29, 16 }
 0x194   : > { %1705 = vmatpush3.bf16.msra.mxu1 %v1861_v15  ;;  %1721 = vmatpush3.bf16.msra.mxu0 %v1862_v16  ;;  %v613_v54 = vpop.permute.xlu0 %612  ;;  %v678_v58 = vrot.slane %v676_v47, 1 }
 0x195   : > { %v621_v27 = vpop.permute.xlu1 %620  ;;  %1706 = vmatprep.subr.bf16.mxu1 %v1863_v20  ;;  %1722 = vmatprep.subr.bf16.mxu0 %v1864_v21  ;;  %v646_v56 = vsel %vm622_vm5, %v2180_v39, %v613_v54 }
 0x196   : > { %v650_v30 = vsel %vm622_vm5, %v618_v17, %v621_v27  ;;  %v1887_v17 = vld [vmem:[%s2360_s4 + $0x230] sm:$0xff]   ;;  %v679_v62 = vor.u32 %v678_v58, %v674_v33 }
 0x197   : > { %1423 = vmatprep.mubr.bf16.mxu0 %v650_v30 }
 0x198   : > { %1707 = vmatpush3.bf16.msra.mxu1 %v1865_v22  ;;  %1723 = vmatpush3.bf16.msra.mxu0 %v1866_v23 }
 0x199   : > { %1708 = vmatprep.subr.bf16.mxu1 %v1867_v19  ;;  %1724 = vmatprep.subr.bf16.mxu0 %v1868_v28  ;;  %v669_v24 = vpop.permute.xlu1 %668 }
 0x19a   : > { %v673_v39 = vsel %vm622_vm5, %v2166_v26, %v669_v24 }
 0x19b   : > { %v680_v37 = vshll.u32 %v673_v39, 16 }
 0x19c   : > { %1709 = vmatpush3.bf16.msra.mxu1 %v1869_v31  ;;  %1725 = vmatpush3.bf16.msra.mxu0 %v1870_v32 }
 0x19d   : > { %1710 = vmatprep.subr.bf16.mxu1 %v1871_v34  ;;  %1726 = vmatprep.subr.bf16.mxu0 %v1872_v36  ;;  %v682_v61 = vrot.slane %v680_v37, 1 }
 0x19f   : > { %v683_v26 = vsel %vm518_vm3, %v679_v62, %v682_v61 }
 0x1a0   : > { %1711 = vmatpush3.bf16.msra.mxu1 %v1873_v38  ;;  %1727 = vmatpush3.bf16.msra.mxu0 %v1874_v40 }
 0x1a1   : > { %1728 = vmatprep.subr.bf16.mxu0 %v1875_v41  ;;  %1777 = vmatprep.subr.bf16.mxu1 %v1898_v45 }
 0x1a3   : > { %1383 = vmatmul.mubr.bf16.vlgmr.msra.gmra.mrb[4].mxu1 %v639_v48 }
 0x1a4   : > { %1729 = vmatpush3.bf16.msra.mxu0 %v1876_v42  ;;  %1778 = vmatpush3.bf16.msra.mxu1 %v1877_v43 }
 0x1a5   : > { %1730 = vmatprep.subr.bf16.mxu0 %v1878_v46  ;;  %1779 = vmatprep.subr.bf16.mxu1 %v1898_v45 }
 0x1a6   : > { %1793 = vmatprep.mubr.msk.bf16.mxu1 %vm1899_vm6, %v1898_v45 }
 0x1a8   : > { %1731 = vmatpush3.bf16.msra.mxu0 %v1879_v49  ;;  %1780 = vmatpush3.bf16.msra.mxu1 %v1880_v6 }
 0x1a9   : > { %1732 = vmatprep.subr.bf16.mxu0 %v1881_v51  ;;  %1781 = vmatprep.subr.bf16.mxu1 %v1898_v45 }
 0x1ac   : > { %1733 = vmatpush3.bf16.msra.mxu0 %v1882_v52  ;;  %1782 = vmatpush3.bf16.msra.mxu1 %v1883_v53 }
 0x1ad   : > { %1783 = vmatprep.subr.bf16.mxu1 %v1898_v45 }
 0x1af   : > { %1424 = vmatmul.mubr.bf16.vlgmr.msra.gmra.mrb[16].mxu0 %v646_v56 }
 0x1b0   : > { %1784 = vmatpush3.bf16.msra.mxu1 %v1884_v55 }
 0x1b1   : > { %1785 = vmatprep.subr.bf16.mxu1 %v1898_v45 }
 0x1b4   : > { %1786 = vmatpush3.bf16.msra.mxu1 %v1885_v57 }
 0x1b5   : > { %1787 = vmatprep.subr.bf16.mxu1 %v1898_v45 }
 0x1b8   : > { %1788 = vmatpush3.bf16.msra.mxu1 %v1886_v35 }
 0x1b9   : > { %1789 = vmatprep.subr.bf16.mxu1 %v1898_v45 }
 0x1bc   : > { %1790 = vmatpush3.bf16.msra.mxu1 %v1887_v17 }
 0x1bd   : > { %1791 = vmatprep.subr.bf16.mxu1 %v1898_v45 }
 0x1c0   : > { %1792 = vmatpush3.bf16.msra.mxu1 %v1888_v59 }
 0x1c3   : > { %1794 = vmatmul.mubr.bf16.vlgmr.msra.gmra.mrb[8].mxu1 %v683_v26 }
 0x256   : > { %v1668_v60 = vpop.f32.mrb[0].mxu1 }
 0x257   : > { %v1669_v63 = vpop.f32.mrb[1].mxu1 }
 0x258   : > { %v1670_v0 = vadd.f32 %v1669_v63, %v1668_v60  ;;  %v1671_v1 = vpop.f32.mrb[2].mxu1 }
 0x259   : > { %v1672_v2 = vpop.f32.mrb[3].mxu1 }
 0x25a   : > { %v1673_v3 = vadd.f32 %v1672_v2, %v1671_v1  ;;  %v1303_v7 = vadd.f32 %v1670_v0, %v1561_v4 }
 0x25c   : > { %v1306_v11 = vadd.f32 %v1673_v3, %v1561_v4 }
 0x262   : > { %v1690_v5 = vpop.f32.mrb[12].mxu0 }
 0x263   : > { %v1691_v25 = vpop.f32.mrb[13].mxu0 }
 0x264   : > { %v1692_v8 = vadd.f32 %v1691_v25, %v1690_v5  ;;  %v1693_v9 = vpop.f32.mrb[14].mxu0 }
 0x265   : > { %v1694_v10 = vpop.f32.mrb[15].mxu0 }
 0x266   : > { %v1344_v12 = vadd.f32 %v1692_v8, %v1303_v7  ;;  %v1695_v13 = vadd.f32 %v1694_v10, %v1693_v9 }
 0x268   : > { %v1347_v44 = vadd.f32 %v1695_v13, %v1306_v11 }
 0x276   : > { %v1712_v14 = vpop.f32.mrb[4].mxu1 }
 0x277   : > { %v1713_v15 = vpop.f32.mrb[5].mxu1 }
 0x278   : > { %v1714_v16 = vadd.f32 %v1713_v15, %v1712_v14  ;;  %v1715_v18 = vpop.f32.mrb[6].mxu1 }
 0x279   : > { %v1716_v20 = vpop.f32.mrb[7].mxu1 }
 0x27a   : > { %v1385_v21 = vadd.f32 %v1714_v16, %v1344_v12  ;;  %v1717_v22 = vadd.f32 %v1716_v20, %v1715_v18 }
 0x27c   : > { %v1388_v23 = vadd.f32 %v1717_v22, %v1347_v44 }
 0x282   : > { %v1734_v27 = vpop.f32.mrb[16].mxu0 }
 0x283   : > { %v1735_v19 = vpop.f32.mrb[17].mxu0 }
 0x284   : > { %v1736_v28 = vadd.f32 %v1735_v19, %v1734_v27  ;;  %v1737_v30 = vpop.f32.mrb[18].mxu0 }
 0x285   : > { %v1738_v31 = vpop.f32.mrb[19].mxu0 }
 0x286   : > { %v1739_v32 = vadd.f32 %v1738_v31, %v1737_v30  ;;  %v1426_v34 = vadd.f32 %v1736_v28, %v1385_v21 }
 0x288   : > { %v1429_v36 = vadd.f32 %v1739_v32, %v1388_v23 }
 0x296   : > { %v1466_v38 = vpop.f32.mrb[8].mxu1 }
 0x297   : > { %v1467_v40 = vadd.f32 %v1466_v38, %v1426_v34  ;;  %v1795_v41 = vpop.f32.mrb[9].mxu1 }
 0x298   : > { %v1469_v42 = vpop.f32.mrb[10].mxu1 }
 0x299   : > { %1473 = vst [vmem:[%s271_s29] sm:$0xff] %v1467_v40  ;;  %v1470_v43 = vadd.f32 %v1469_v42, %v1429_v36  ;;  %v1796_v45 = vpop.f32.mrb[11].mxu1 }
 0x29b   : > { %1474 = vst [vmem:[%s271_s29 + $0x8] sm:$0xff] %v1470_v43 }
 0x29c PF: > { %s16_s21 = sadd.s32 1, %s1895_s21  }
 0x29d   : > { %p13_p4 = scmp.ge.s32.totalorder %s16_s21, 4  }
 0x29f   :  { %15 = sbr.rel (!%p13_p4) target bundleno = 1 (0x1), region = 77 }

</bundles_post_ra>
